<compile_context>
chip_gen: v6e
topology: v6e:2x2x1
jax: 0.10.0
libtpu: 0.0.40
codegen_flags: <defaults>
</compile_context>

<pallas_src>
import functools

import jax
import jax.numpy as jnp
from jax.experimental import pallas as pl
from jax.experimental.pallas import tpu as pltpu


def _round_up(x, m):
    return (x + m - 1) // m * m


# ---------------------------------------------------------------------------
# Kernel: three fused matmuls over the block-diagonal packed weights.
# ---------------------------------------------------------------------------
def _fused_ensemble_kernel(q_ref, w1_ref, b1_ref, w2_ref, b2_ref, w3_ref, b3_ref,
                           o_ref):
    # q_ref:  (Bt, D)
    # w1_ref: (D, EUp)        b1_ref: (1, EUp)   (f32)
    # w2_ref: (EUp, EUp)      b2_ref: (1, EUp)   (block-diagonal)
    # w3_ref: (EUp, EDp)      b3_ref: (1, EDp)   (block-diagonal)
    # o_ref:  (Bt, EDp)
    #
    # Mosaic's f32 matmul runs true f32 passes on the MXU (no silent bf16
    # decomposition in-kernel); bf16 weights run the single-pass bf16 path.
    # Accumulation is always f32 via preferred_element_type; bias + ReLU f32.
    wdt = w1_ref.dtype

    q = q_ref[...].astype(wdt)
    h1 = jnp.dot(q, w1_ref[...], preferred_element_type=jnp.float32)
    h1 = jnp.maximum(h1 + b1_ref[...], 0.0)

    h2 = jnp.dot(h1.astype(wdt), w2_ref[...], preferred_element_type=jnp.float32)
    h2 = jnp.maximum(h2 + b2_ref[...], 0.0)

    out = jnp.dot(h2.astype(wdt), w3_ref[...], preferred_element_type=jnp.float32)
    o_ref[...] = (out + b3_ref[...]).astype(o_ref.dtype)


# ---------------------------------------------------------------------------
# One-time weight repacking (ensemble axis fused into the matmul N axis,
# lane dims padded to multiples of 128).  Call ONCE at model-build time.
# ---------------------------------------------------------------------------
def pack_params(w1, b1, w2, b2, w3, b3, weight_dtype=jnp.float32):
    """Repack per-member params [E, in, out] into fused / block-diagonal form."""
    E, D, U = w1.shape
    EU, ED = E * U, E * D
    EUp, EDp = _round_up(EU, 128), _round_up(ED, 128)

    # Layer 1: concatenate member outputs along N -> [D, EU], pad lanes.
    w1p = jnp.transpose(w1, (1, 0, 2)).reshape(D, EU)
    w1p = jnp.pad(w1p, ((0, 0), (0, EUp - EU))).astype(weight_dtype)
    b1p = jnp.pad(b1.reshape(1, EU), ((0, 0), (0, EUp - EU))).astype(jnp.float32)

    eye = jnp.eye(E, dtype=w2.dtype)
    # Layer 2: block-diagonal [EU, EU]; off-diagonal blocks are exact zeros.
    w2p = jnp.einsum('eio,ef->eifo', w2, eye).reshape(EU, EU)
    w2p = jnp.pad(w2p, ((0, EUp - EU), (0, EUp - EU))).astype(weight_dtype)
    b2p = jnp.pad(b2.reshape(1, EU), ((0, 0), (0, EUp - EU))).astype(jnp.float32)

    # Layer 3: block-diagonal [EU, ED], padded to lane-dense [EUp, EDp].
    w3p = jnp.einsum('eio,ef->eifo', w3, eye).reshape(EU, ED)
    w3p = jnp.pad(w3p, ((0, EUp - EU), (0, EDp - ED))).astype(weight_dtype)
    b3p = jnp.pad(b3.reshape(1, ED), ((0, 0), (0, EDp - ED))).astype(jnp.float32)

    return w1p, b1p, w2p, b2p, w3p, b3p


# ---------------------------------------------------------------------------
# Forward over pre-packed params (jitted once via make_batch_ensemble).
# ---------------------------------------------------------------------------
def _forward_packed(q, w1p, b1p, w2p, b2p, w3p, b3p, *, E, D, U):
    B = q.shape[0]
    ED = E * D
    EDp = w3p.shape[1]

    # Batch tiling: one step at small B; 256-row blocks (multiple of 8
    # sublanes) sharded across TensorCores when B is large.  Per-step VMEM
    # footprint stays < 1 MiB, portable to v7x's 64 MiB VMEM.
    block_b = B if B <= 256 else 256
    grid = (pl.cdiv(B, block_b),)

    def full_spec(arr):
        return pl.BlockSpec(arr.shape, lambda i: (0, 0))

    # Effective work only (zero off-diagonal blocks excluded).
    flops = 2 * B * E * (D * U + U * U + U * D)
    bytes_accessed = int(
        q.size * q.dtype.itemsize
        + sum(p.size * p.dtype.itemsize for p in (w1p, b1p, w2p, b2p, w3p, b3p))
        + B * EDp * q.dtype.itemsize
    )

    out_flat = pl.pallas_call(
        _fused_ensemble_kernel,
        out_shape=jax.ShapeDtypeStruct((B, EDp), q.dtype),
        grid=grid,
        in_specs=[
            pl.BlockSpec((block_b, D), lambda i: (i, 0)),
            full_spec(w1p), full_spec(b1p),
            full_spec(w2p), full_spec(b2p),
            full_spec(w3p), full_spec(b3p),
        ],
        out_specs=pl.BlockSpec((block_b, EDp), lambda i: (i, 0)),
        compiler_params=pltpu.CompilerParams(
            dimension_semantics=("parallel",)),
        cost_estimate=pl.CostEstimate(
            flops=flops, transcendentals=0, bytes_accessed=bytes_accessed),
    )(q, w1p, b1p, w2p, b2p, w3p, b3p)

    # Column block e*D:(e+1)*D is member e's output -> drop lane padding, then
    # a free, layout-preserving reshape to [B, E, D] (matches torch.stack dim=1).
    return out_flat[:, :ED].reshape(B, E, D)


def make_batch_ensemble(w1, b1, w2, b2, w3, b3, weight_dtype=jnp.float32):
    """Pack params once and return a jitted forward: q [B, D] -> [B, E, D]."""
    E, D, U = w1.shape
    packed = pack_params(w1, b1, w2, b2, w3, b3, weight_dtype=weight_dtype)
    fwd = jax.jit(functools.partial(_forward_packed, E=E, D=D, U=U))
    return lambda q: fwd(q, *packed)


# ---------------------------------------------------------------------------
# Parameter init (matches nn.Linear default: uniform +-1/sqrt(fan_in)).
# Weights stored as [E, in, out]; biases as [E, 1, out].
# ---------------------------------------------------------------------------
def init_params(key, ensemble_size, dim, units, dtype=jnp.float32):
    keys = jax.random.split(key, 6)

    def unif(k, shape, fan_in):
        bound = 1.0 / (fan_in ** 0.5)
        return jax.random.uniform(k, shape, dtype=dtype, minval=-bound, maxval=bound)

    w1 = unif(keys[0], (ensemble_size, dim, units), dim)
    b1 = unif(keys[1], (ensemble_size, 1, units), dim)
    w2 = unif(keys[2], (ensemble_size, units, units), units)
    b2 = unif(keys[3], (ensemble_size, 1, units), units)
    w3 = unif(keys[4], (ensemble_size, units, dim), units)
    b3 = unif(keys[5], (ensemble_size, 1, dim), units)
    return w1, b1, w2, b2, w3, b3


def reference_forward(q, w1, b1, w2, b2, w3, b3):
    """Pure-JAX reference matching the PyTorch per-member forward."""
    outs = []
    E = w1.shape[0]
    for e in range(E):
        h1 = jnp.maximum(q @ w1[e] + b1[e], 0.0)
        h2 = jnp.maximum(h1 @ w2[e] + b2[e], 0.0)
        outs.append(h2 @ w3[e] + b3[e])
    return jnp.stack(outs, axis=1)  # [B, E, D]


if __name__ == "__main__":
    # Small shapes consistent with the module (vector_size, units, ensemble_size);
    # layers=2 -> 3 Linear layers per member (dim->units, units->units, units->dim).
    B = 2
    DIM = 32
    UNITS = 64
    ENSEMBLE = 3

    key = jax.random.PRNGKey(0)
    k_q, k_p = jax.random.split(key)
    q = jax.random.normal(k_q, (B, DIM), dtype=jnp.float32)
    params = init_params(k_p, ENSEMBLE, DIM, UNITS)

    # Pack once, jit once; per-call path is a single fused pallas_call.
    forward = make_batch_ensemble(*params)          # f32 weights for parity check
    # TODO(synk): for production, pass weight_dtype=jnp.bfloat16 for full-rate
    # MXU and half the per-call weight DMA (accumulation stays f32).

    out = forward(q)
    out = jax.block_until_ready(out)
    out = forward(q)                                # second call: no repack, cached jit
    out = jax.block_until_ready(out)

    ref = reference_forward(q, *params)
    assert out.shape == (B, ENSEMBLE, DIM), out.shape
    assert jnp.allclose(out, ref, atol=1e-5, rtol=1e-5), float(jnp.max(jnp.abs(out - ref)))

    print("KERNEL_OK")
</pallas_src>

<mosaic_0001>
module attributes {stable_mosaic.version = 11 : i64} {
  func.func @_fused_ensemble_kernel(%arg0: i32, %arg1: memref<2x32xf32, #tpu.memory_space<vmem>>, %arg2: memref<32x256xf32, #tpu.memory_space<vmem>>, %arg3: memref<1x256xf32, #tpu.memory_space<vmem>>, %arg4: memref<256x256xf32, #tpu.memory_space<vmem>>, %arg5: memref<1x256xf32, #tpu.memory_space<vmem>>, %arg6: memref<256x128xf32, #tpu.memory_space<vmem>>, %arg7: memref<1x128xf32, #tpu.memory_space<vmem>>, %arg8: memref<2x128xf32, #tpu.memory_space<vmem>>) attributes {dimension_semantics = [#tpu.dimension_semantics<parallel>], iteration_bounds = array<i64: 1>, scalar_prefetch = 0 : i64, scratch_operands = 0 : i64, tpu.core_type = #tpu.core_type<tc>, window_params = [{transform_indices = @transform_0, window_bounds = array<i64: 2, 32>}, {pipeline_mode = #tpu.pipeline_mode<synchronous>, transform_indices = @transform_1, window_bounds = array<i64: 32, 256>}, {pipeline_mode = #tpu.pipeline_mode<synchronous>, transform_indices = @transform_2, window_bounds = array<i64: 1, 256>}, {pipeline_mode = #tpu.pipeline_mode<synchronous>, transform_indices = @transform_3, window_bounds = array<i64: 256, 256>}, {pipeline_mode = #tpu.pipeline_mode<synchronous>, transform_indices = @transform_4, window_bounds = array<i64: 1, 256>}, {pipeline_mode = #tpu.pipeline_mode<synchronous>, transform_indices = @transform_5, window_bounds = array<i64: 256, 128>}, {pipeline_mode = #tpu.pipeline_mode<synchronous>, transform_indices = @transform_6, window_bounds = array<i64: 1, 128>}, {transform_indices = @transform_7, window_bounds = array<i64: 2, 128>}]} {
    %c0 = arith.constant 0 : index
    %c0_0 = arith.constant 0 : index
    %0 = vector.load %arg1[%c0, %c0_0] : memref<2x32xf32, #tpu.memory_space<vmem>>, vector<2x32xf32>
    %c0_1 = arith.constant 0 : index
    %c0_2 = arith.constant 0 : index
    %1 = vector.load %arg2[%c0_1, %c0_2] : memref<32x256xf32, #tpu.memory_space<vmem>>, vector<32x256xf32>
    %cst = arith.constant dense<0.000000e+00> : vector<2x256xf32>
    %2 = tpu.matmul %0, %1, %cst {dimension_numbers = #tpu.dot_dimension_numbers<[1], [0], [0], [1], [0, 0, 1, 1], [], []>} : vector<2x32xf32>, vector<32x256xf32>, vector<2x256xf32> -> vector<2x256xf32>
    %c0_3 = arith.constant 0 : index
    %c0_4 = arith.constant 0 : index
    %3 = vector.load %arg3[%c0_3, %c0_4] : memref<1x256xf32, #tpu.memory_space<vmem>>, vector<1x256xf32>
    %4 = vector.broadcast %3 : vector<1x256xf32> to vector<2x256xf32>
    %5 = arith.addf %2, %4 : vector<2x256xf32>
    %cst_5 = arith.constant 0.000000e+00 : f32
    %6 = vector.broadcast %cst_5 : f32 to vector<2x256xf32>
    %7 = arith.maximumf %5, %6 : vector<2x256xf32>
    %c0_6 = arith.constant 0 : index
    %c0_7 = arith.constant 0 : index
    %8 = vector.load %arg4[%c0_6, %c0_7] : memref<256x256xf32, #tpu.memory_space<vmem>>, vector<256x256xf32>
    %cst_8 = arith.constant dense<0.000000e+00> : vector<2x256xf32>
    %9 = tpu.matmul %7, %8, %cst_8 {dimension_numbers = #tpu.dot_dimension_numbers<[1], [0], [0], [1], [0, 0, 1, 1], [], []>} : vector<2x256xf32>, vector<256x256xf32>, vector<2x256xf32> -> vector<2x256xf32>
    %c0_9 = arith.constant 0 : index
    %c0_10 = arith.constant 0 : index
    %10 = vector.load %arg5[%c0_9, %c0_10] : memref<1x256xf32, #tpu.memory_space<vmem>>, vector<1x256xf32>
    %11 = vector.broadcast %10 : vector<1x256xf32> to vector<2x256xf32>
    %12 = arith.addf %9, %11 : vector<2x256xf32>
    %cst_11 = arith.constant 0.000000e+00 : f32
    %13 = vector.broadcast %cst_11 : f32 to vector<2x256xf32>
    %14 = arith.maximumf %12, %13 : vector<2x256xf32>
    %c0_12 = arith.constant 0 : index
    %c0_13 = arith.constant 0 : index
    %15 = vector.load %arg6[%c0_12, %c0_13] : memref<256x128xf32, #tpu.memory_space<vmem>>, vector<256x128xf32>
    %cst_14 = arith.constant dense<0.000000e+00> : vector<2x128xf32>
    %16 = tpu.matmul %14, %15, %cst_14 {dimension_numbers = #tpu.dot_dimension_numbers<[1], [0], [0], [1], [0, 0, 1, 1], [], []>} : vector<2x256xf32>, vector<256x128xf32>, vector<2x128xf32> -> vector<2x128xf32>
    %c0_15 = arith.constant 0 : index
    %c0_16 = arith.constant 0 : index
    %17 = vector.load %arg7[%c0_15, %c0_16] : memref<1x128xf32, #tpu.memory_space<vmem>>, vector<1x128xf32>
    %18 = vector.broadcast %17 : vector<1x128xf32> to vector<2x128xf32>
    %19 = arith.addf %16, %18 : vector<2x128xf32>
    %c0_17 = arith.constant 0 : index
    %c0_18 = arith.constant 0 : index
    %20 = vector.load %arg8[%c0_17, %c0_18] : memref<2x128xf32, #tpu.memory_space<vmem>>, vector<2x128xf32>
    tpu.vector_store %arg8[%c0_17, %c0_18], %19 {strides = array<i32>} : memref<2x128xf32, #tpu.memory_space<vmem>>, vector<2x128xf32>,
    return
  }
  func.func @transform_0(%arg0: i32) -> (i32, i32) {
    %c0_i32 = arith.constant 0 : i32
    %c0_i32_0 = arith.constant 0 : i32
    return %arg0, %c0_i32 : i32, i32
  }
  func.func @transform_1(%arg0: i32) -> (i32, i32) {
    %c0_i32 = arith.constant 0 : i32
    %c0_i32_0 = arith.constant 0 : i32
    %c0_i32_1 = arith.constant 0 : i32
    return %c0_i32, %c0_i32_0 : i32, i32
  }
  func.func @transform_2(%arg0: i32) -> (i32, i32) {
    %c0_i32 = arith.constant 0 : i32
    %c0_i32_0 = arith.constant 0 : i32
    %c0_i32_1 = arith.constant 0 : i32
    return %c0_i32, %c0_i32_0 : i32, i32
  }
  func.func @transform_3(%arg0: i32) -> (i32, i32) {
    %c0_i32 = arith.constant 0 : i32
    %c0_i32_0 = arith.constant 0 : i32
    %c0_i32_1 = arith.constant 0 : i32
    return %c0_i32, %c0_i32_0 : i32, i32
  }
  func.func @transform_4(%arg0: i32) -> (i32, i32) {
    %c0_i32 = arith.constant 0 : i32
    %c0_i32_0 = arith.constant 0 : i32
    %c0_i32_1 = arith.constant 0 : i32
    return %c0_i32, %c0_i32_0 : i32, i32
  }
  func.func @transform_5(%arg0: i32) -> (i32, i32) {
    %c0_i32 = arith.constant 0 : i32
    %c0_i32_0 = arith.constant 0 : i32
    %c0_i32_1 = arith.constant 0 : i32
    return %c0_i32, %c0_i32_0 : i32, i32
  }
  func.func @transform_6(%arg0: i32) -> (i32, i32) {
    %c0_i32 = arith.constant 0 : i32
    %c0_i32_0 = arith.constant 0 : i32
    %c0_i32_1 = arith.constant 0 : i32
    return %c0_i32, %c0_i32_0 : i32, i32
  }
  func.func @transform_7(%arg0: i32) -> (i32, i32) {
    %c0_i32 = arith.constant 0 : i32
    %c0_i32_0 = arith.constant 0 : i32
    return %arg0, %c0_i32 : i32, i32
  }
}

</mosaic_0001>

<bundles_post_ra>
// kernel: _forward_packed.1
= control target key start
LH: loop header
LB: loop body
LE: loop exit
PB: predicated region body
PF: predicated region fallthrough
CT: control target
= control target key end

     0   :  { %12 = vsyncpa [#allocation3], 0  ;;  %s648_s0 = inlined_call_operand.hbm [shape: f32[2,32], index: 0, kind: input, shape index: {}]   ;;  %s649_s1 = inlined_call_operand.hbm [shape: f32[32,256], index: 1, kind: input, shape index: {}]   ;;  %s650_s2 = inlined_call_operand.vmem [shape: f32[1,256], index: 2, kind: input, shape index: {}]   ;;  %s651_s3 = inlined_call_operand.hbm [shape: f32[256,256], index: 3, kind: input, shape index: {}]   ;;  %s652_s4 = inlined_call_operand.vmem [shape: f32[1,256], index: 4, kind: input, shape index: {}]   ;;  %s653_s5 = inlined_call_operand.hbm [shape: f32[256,128], index: 5, kind: input, shape index: {}]   ;;  %s654_s6 = inlined_call_operand.vmem [shape: f32[1,128], index: 6, kind: input, shape index: {}]   ;;  %s655_s7 = inlined_call_operand.vmem [shape: f32[2,128], index: 7, kind: output, shape index: {}]  }
   0x1   :  { %13 = vsyncpa [#allocation5], 0 }
   0x2   :  { %14 = vsyncpa [#allocation8], 0  ;;  %s575_s24 = smov [#allocation4]  }
   0x3   :  { %s30_s25 = sshll.u32 %s575_s24, 4  ;;  %s31_s25 = int_to_ptr.vmem [resolvable:$true] %s30_s25 }
   0x4   :  { %s497_s26 = scalar_lea.vmem %s31_s25, 1024  ;;  %p502_p1 = scmp.lt.s32.totalorder %s31_s25, %s31_s25 }
   0x5   :  { %p498_p0 = scmp.ne.s32.totalorder %s31_s25, %s497_s26  ;;  %p503_p2 = scmp.lt.s32.totalorder %s497_s26, %s497_s26 }
   0x7   :  { %p504_p3 = por %p503_p2, %p502_p1 }
   0x9   :  { %p505_p4 = pnand %p504_p3, %p498_p0 }
   0xb   :  { %508 = shalt.err (!%p505_p4)
}
   0xc   :  { %s576_s27 = smov 256   ;;  %s577_s28 = smov 16  }
   0xd   :  { %36 = dma.hbm_to_vmem [thread:$0]  %s649_s1, 1024, %s31_s25, [#allocation5], %s576_s27, %s576_s27, %s577_s28  }
   0xe   :  { %s578_s8 = smov [#allocation2]   ;;  %s579_s10 = smov [#allocation6]  }
   0xf   :  { %s21_s9 = sshll.u32 %s578_s8, 4  ;;  %s44_s11 = sshll.u32 %s579_s10, 4  ;;  %s22_s9 = int_to_ptr.vmem [resolvable:$true] %s21_s9  ;;  %s45_s11 = int_to_ptr.vmem [resolvable:$true] %s44_s11 }
  0x10   :  { %s517_s12 = scalar_lea.vmem %s22_s9, 32  ;;  %p522_p6 = scmp.lt.s32.totalorder %s22_s9, %s22_s9 }
  0x11   :  { %p518_p5 = scmp.ne.s32.totalorder %s22_s9, %s517_s12  ;;  %p523_p7 = scmp.lt.s32.totalorder %s517_s12, %s517_s12 }
  0x13   :  { %p524_p8 = por %p523_p7, %p522_p6 }
  0x15   :  { %p525_p9 = pnand %p524_p8, %p518_p5 }
  0x17   :  { %528 = shalt.err (!%p525_p9)
}
  0x18   :  { %24 = dma.hbm_to_vmem [thread:$0]  %s648_s0, 32, %s22_s9, [#allocation3]  }
  0x19   :  { %s537_s15 = scalar_lea.vmem %s45_s11, 8192  ;;  %p542_p11 = scmp.lt.s32.totalorder %s45_s11, %s45_s11 }
  0x1a   :  { %p538_p10 = scmp.ne.s32.totalorder %s45_s11, %s537_s15  ;;  %p543_p12 = scmp.lt.s32.totalorder %s537_s15, %s537_s15 }
  0x1c   :  { %p544_p13 = por %p543_p12, %p542_p11 }
  0x1e   :  { %p545_p0 = pnand %p544_p13, %p538_p10 }
  0x20   :  { %548 = shalt.err (!%p545_p0)
}
  0x21   :  { %50 = dma.hbm_to_vmem [thread:$0]  %s651_s3, 8192, %s45_s11, [#allocation5], %s576_s27, %s576_s27, %s577_s28  }
  0x22   :  { %s580_s17 = smov [#allocation7]  }
  0x23   :  { %s58_s18 = sshll.u32 %s580_s17, 4  ;;  %s59_s18 = int_to_ptr.vmem [resolvable:$true] %s58_s18 }
  0x24   :  { %s557_s19 = scalar_lea.vmem %s59_s18, 4096  ;;  %p562_p2 = scmp.lt.s32.totalorder %s59_s18, %s59_s18 }
  0x25   :  { %p558_p1 = scmp.ne.s32.totalorder %s59_s18, %s557_s19  ;;  %p563_p3 = scmp.lt.s32.totalorder %s557_s19, %s557_s19 }
  0x27   :  { %p564_p4 = por %p563_p3, %p562_p2 }
  0x29   :  { %p565_p5 = pnand %p564_p4, %p558_p1 }
  0x2b   :  { %568 = shalt.err (!%p565_p5)
}
  0x2c   :  { %s581_s0 = smov 128   ;;  %s582_s20 = smov 8  }
  0x2d   :  { %64 = dma.hbm_to_vmem [thread:$0]  %s653_s5, 4096, %s59_s18, [#allocation8], %s581_s0, %s581_s0, %s582_s20  }
  0x2e   :  { %569 = dma.done.wait [#allocation3], 32  }
  0x2f   :  { %570 = vsyncadd [#allocation3], 4294967264 }
  0x30   :  { %571 = dma.done.wait [#allocation5], 9216  }
  0x31   :  { %572 = vsyncadd [#allocation5], 4294958080 }
  0x32   :  { %573 = dma.done.wait [#allocation8], 4096  }
  0x33   :  { %574 = vsyncadd [#allocation8], 4294963200  ;;  %v583_v0 = vmov 0.0   ;;  %v87_v1 = vld [vmem:[#allocation4 + $0x38] sm:$0xff]  ;;  %v86_v2 = vld [vmem:[#allocation4 + $0x30] sm:$0xff]  ;;  %vm100_vm0 = vcmask 261120  }
  0x34   :  { %168 = vmatprep.mubr.f32.mxu0 %v583_v0  ;;  %v85_v3 = vld [vmem:[#allocation4 + $0x28] sm:$0xff]  ;;  %128 = vmatprep.subr.mxu0 %v87_v1  ;;  %v84_v4 = vld [vmem:[#allocation4 + $0x20] sm:$0xff]  ;;  %v83_v5 = vld [vmem:[#allocation4 + $0x18] sm:$0xff] }
  0x35   :  { %129 = vmatpush1.msra.mxu0 %v86_v2  ;;  %v82_v6 = vld [vmem:[#allocation4 + $0x10] sm:$0xff]  ;;  %v208_v7 = vld [vmem:[#allocation6 + $0xf8] sm:$0xff]  ;;  %v206_v9 = vld [vmem:[#allocation6 + $0xe8] sm:$0xff] }
  0x36   :  { %130 = vmatprep.subr.mxu0 %v85_v3  ;;  %v207_v8 = vld [vmem:[#allocation6 + $0xf0] sm:$0xff]  ;;  %v81_v10 = vld [vmem:[#allocation4 + $0x8] sm:$0xff]  ;;  %253 = vmatprep.subr.mxu1 %v208_v7  ;;  %v205_v11 = vld [vmem:[#allocation6 + $0xe0] sm:$0xff] }
  0x37   :  { %131 = vmatpush1.msra.mxu0 %v84_v4  ;;  %v80_v12 = vld [vmem:[#allocation4] sm:$0xff]  ;;  %254 = vmatpush1.msra.mxu1 %v207_v8  ;;  %v204_v13 = vld [vmem:[#allocation6 + $0xd8] sm:$0xff]  ;;  %v203_v15 = vld [vmem:[#allocation6 + $0xd0] sm:$0xff] }
  0x38   :  { %132 = vmatprep.subr.mxu0 %v83_v5  ;;  %v79_v14 = vld [vmem:[#allocation2] sm:$0x3]  ;;  %255 = vmatprep.subr.mxu1 %v206_v9  ;;  %v202_v16 = vld [vmem:[#allocation6 + $0xc8] sm:$0xff]  ;;  %v201_v17 = vld [vmem:[#allocation6 + $0xc0] sm:$0xff] }
  0x39   :  { %133 = vmatpush1.msra.mxu0 %v82_v6  ;;  %256 = vmatpush1.msra.mxu1 %v205_v11  ;;  %v200_v18 = vld [vmem:[#allocation6 + $0xb8] sm:$0xff]  ;;  %v199_v19 = vld [vmem:[#allocation6 + $0xb0] sm:$0xff]  ;;  %v198_v20 = vld [vmem:[#allocation6 + $0xa8] sm:$0xff] }
  0x3a   :  { %134 = vmatprep.subr.mxu0 %v81_v10  ;;  %257 = vmatprep.subr.mxu1 %v204_v13  ;;  %v197_v21 = vld [vmem:[#allocation6 + $0xa0] sm:$0xff]  ;;  %v196_v22 = vld [vmem:[#allocation6 + $0x98] sm:$0xff]  ;;  %v195_v23 = vld [vmem:[#allocation6 + $0x90] sm:$0xff] }
  0x3b   :  { %135 = vmatpush1.msra.mxu0 %v80_v12  ;;  %258 = vmatpush1.msra.mxu1 %v203_v15  ;;  %v194_v24 = vld [vmem:[#allocation6 + $0x88] sm:$0xff]  ;;  %v193_v25 = vld [vmem:[#allocation6 + $0x80] sm:$0xff]  ;;  %v192_v26 = vld [vmem:[#allocation6 + $0x78] sm:$0xff] }
  0x3c   :  { %443 = vmatmul.mubr.msk.f32.vlgmr.msra.gmra.mxu0 %vm100_vm0, %v79_v14  ;;  %259 = vmatprep.subr.mxu1 %v202_v16  ;;  %v191_v27 = vld [vmem:[#allocation6 + $0x70] sm:$0xff]  ;;  %v190_v28 = vld [vmem:[#allocation6 + $0x68] sm:$0xff]  ;;  %v189_v29 = vld [vmem:[#allocation6 + $0x60] sm:$0xff] }
  0x3d   :  { %260 = vmatpush1.msra.mxu1 %v201_v17  ;;  %v188_v30 = vld [vmem:[#allocation6 + $0x58] sm:$0xff]  ;;  %v187_v31 = vld [vmem:[#allocation6 + $0x50] sm:$0xff]  ;;  %v186_v32 = vld [vmem:[#allocation6 + $0x48] sm:$0xff] }
  0x3e   :  { %261 = vmatprep.subr.mxu1 %v200_v18  ;;  %v185_v33 = vld [vmem:[#allocation6 + $0x40] sm:$0xff]  ;;  %v184_v34 = vld [vmem:[#allocation6 + $0x38] sm:$0xff]  ;;  %v183_v35 = vld [vmem:[#allocation6 + $0x30] sm:$0xff] }
  0x3f   :  { %262 = vmatpush1.msra.mxu1 %v199_v19  ;;  %v182_v36 = vld [vmem:[#allocation6 + $0x28] sm:$0xff]  ;;  %v181_v37 = vld [vmem:[#allocation6 + $0x20] sm:$0xff]  ;;  %v180_v38 = vld [vmem:[#allocation6 + $0x18] sm:$0xff] }
  0x40   :  { %263 = vmatprep.subr.mxu1 %v198_v20  ;;  %v179_v39 = vld [vmem:[#allocation6 + $0x10] sm:$0xff]  ;;  %v178_v40 = vld [vmem:[#allocation6 + $0x8] sm:$0xff]  ;;  %v177_v41 = vld [vmem:[#allocation6] sm:$0xff] }
  0x41   :  { %264 = vmatpush1.msra.mxu1 %v197_v21  ;;  %v240_v42 = vld [vmem:[#allocation6 + $0x1f8] sm:$0xff]  ;;  %v239_v43 = vld [vmem:[#allocation6 + $0x1f0] sm:$0xff]  ;;  %v238_v44 = vld [vmem:[#allocation6 + $0x1e8] sm:$0xff] }
  0x42   :  { %265 = vmatprep.subr.mxu1 %v196_v22  ;;  %v237_v45 = vld [vmem:[#allocation6 + $0x1e0] sm:$0xff]  ;;  %v236_v46 = vld [vmem:[#allocation6 + $0x1d8] sm:$0xff]  ;;  %v235_v47 = vld [vmem:[#allocation6 + $0x1d0] sm:$0xff] }
  0x43   :  { %266 = vmatpush1.msra.mxu1 %v195_v23  ;;  %v234_v48 = vld [vmem:[#allocation6 + $0x1c8] sm:$0xff]  ;;  %v233_v49 = vld [vmem:[#allocation6 + $0x1c0] sm:$0xff]  ;;  %v232_v50 = vld [vmem:[#allocation6 + $0x1b8] sm:$0xff] }
  0x44   :  { %267 = vmatprep.subr.mxu1 %v194_v24  ;;  %v231_v51 = vld [vmem:[#allocation6 + $0x1b0] sm:$0xff]  ;;  %v230_v52 = vld [vmem:[#allocation6 + $0x1a8] sm:$0xff]  ;;  %v229_v53 = vld [vmem:[#allocation6 + $0x1a0] sm:$0xff] }
  0x45   :  { %268 = vmatpush1.msra.mxu1 %v193_v25  ;;  %v228_v54 = vld [vmem:[#allocation6 + $0x198] sm:$0xff]  ;;  %v227_v55 = vld [vmem:[#allocation6 + $0x190] sm:$0xff]  ;;  %v226_v56 = vld [vmem:[#allocation6 + $0x188] sm:$0xff] }
  0x46   :  { %269 = vmatprep.subr.mxu1 %v192_v26  ;;  %v225_v57 = vld [vmem:[#allocation6 + $0x180] sm:$0xff]  ;;  %v224_v58 = vld [vmem:[#allocation6 + $0x178] sm:$0xff]  ;;  %v223_v59 = vld [vmem:[#allocation6 + $0x170] sm:$0xff] }
  0x47   :  { %270 = vmatpush1.msra.mxu1 %v191_v27  ;;  %v222_v60 = vld [vmem:[#allocation6 + $0x168] sm:$0xff]  ;;  %v221_v61 = vld [vmem:[#allocation6 + $0x160] sm:$0xff]  ;;  %v220_v62 = vld [vmem:[#allocation6 + $0x158] sm:$0xff] }
  0x48   :  { %271 = vmatprep.subr.mxu1 %v190_v28  ;;  %v219_v63 = vld [vmem:[#allocation6 + $0x150] sm:$0xff]  ;;  %v218_v0 = vld [vmem:[#allocation6 + $0x148] sm:$0xff]  ;;  %v217_v1 = vld [vmem:[#allocation6 + $0x140] sm:$0xff] }
  0x49   :  { %272 = vmatpush1.msra.mxu1 %v189_v29  ;;  %v216_v2 = vld [vmem:[#allocation6 + $0x138] sm:$0xff]  ;;  %v215_v3 = vld [vmem:[#allocation6 + $0x130] sm:$0xff]  ;;  %v214_v4 = vld [vmem:[#allocation6 + $0x128] sm:$0xff] }
  0x4a   :  { %273 = vmatprep.subr.mxu1 %v188_v30  ;;  %v213_v5 = vld [vmem:[#allocation6 + $0x120] sm:$0xff]  ;;  %v212_v6 = vld [vmem:[#allocation6 + $0x118] sm:$0xff]  ;;  %v211_v7 = vld [vmem:[#allocation6 + $0x110] sm:$0xff] }
  0x4b   :  { %274 = vmatpush1.msra.mxu1 %v187_v31  ;;  %v210_v8 = vld [vmem:[#allocation6 + $0x108] sm:$0xff]  ;;  %v209_v9 = vld [vmem:[#allocation6 + $0x100] sm:$0xff]  ;;  %v357_v10 = vld [vmem:[#allocation7 + $0xf8] sm:$0xff] }
  0x4c   :  { %275 = vmatprep.subr.mxu1 %v186_v32  ;;  %v341_v11 = vld [vmem:[#allocation7 + $0x78] sm:$0xff]  ;;  %v356_v12 = vld [vmem:[#allocation7 + $0xf0] sm:$0xff]  ;;  %445 = vmatprep.subr.mxu0 %v357_v10  ;;  %v355_v14 = vld [vmem:[#allocation7 + $0xe8] sm:$0xff] }
  0x4d   :  { %276 = vmatpush1.msra.mxu1 %v185_v33  ;;  %v340_v13 = vld [vmem:[#allocation7 + $0x70] sm:$0xff]  ;;  %446 = vmatpush3.msra.mxu0 %v341_v11  ;;  %v339_v15 = vld [vmem:[#allocation7 + $0x68] sm:$0xff]  ;;  %v354_v16 = vld [vmem:[#allocation7 + $0xe0] sm:$0xff] }
  0x4e   :  { %277 = vmatprep.subr.mxu1 %v184_v34  ;;  %447 = vmatprep.subr.mxu0 %v356_v12  ;;  %v338_v17 = vld [vmem:[#allocation7 + $0x60] sm:$0xff]  ;;  %v353_v18 = vld [vmem:[#allocation7 + $0xd8] sm:$0xff]  ;;  %v352_v20 = vld [vmem:[#allocation7 + $0xd0] sm:$0xff]  ;;  %v90_v34 = vlaneseq }
  0x4f   :  { %278 = vmatpush1.msra.mxu1 %v183_v35  ;;  %448 = vmatpush3.msra.mxu0 %v340_v13  ;;  %v337_v19 = vld [vmem:[#allocation7 + $0x58] sm:$0xff]  ;;  %v336_v21 = vld [vmem:[#allocation7 + $0x50] sm:$0xff]  ;;  %v351_v22 = vld [vmem:[#allocation7 + $0xc8] sm:$0xff] }
  0x50   :  { %279 = vmatprep.subr.mxu1 %v182_v36  ;;  %449 = vmatprep.subr.mxu0 %v355_v14  ;;  %v335_v23 = vld [vmem:[#allocation7 + $0x48] sm:$0xff]  ;;  %v350_v24 = vld [vmem:[#allocation7 + $0xc0] sm:$0xff]  ;;  %v349_v26 = vld [vmem:[#allocation7 + $0xb8] sm:$0xff]  ;;  %v91_v35 = vshrl.u32 %v90_v34, 7 }
  0x51   :  { %280 = vmatpush1.msra.mxu1 %v181_v37  ;;  %450 = vmatpush3.msra.mxu0 %v339_v15  ;;  %v334_v25 = vld [vmem:[#allocation7 + $0x40] sm:$0xff]  ;;  %v333_v27 = vld [vmem:[#allocation7 + $0x38] sm:$0xff]  ;;  %v348_v28 = vld [vmem:[#allocation7 + $0xb0] sm:$0xff] }
  0x52   :  { %281 = vmatprep.subr.mxu1 %v180_v38  ;;  %451 = vmatprep.subr.mxu0 %v354_v16  ;;  %v332_v29 = vld [vmem:[#allocation7 + $0x30] sm:$0xff]  ;;  %v347_v30 = vld [vmem:[#allocation7 + $0xa8] sm:$0xff]  ;;  %v346_v32 = vld [vmem:[#allocation7 + $0xa0] sm:$0xff]  ;;  %v92_v36 = vsub.s32 0, %v91_v35  ;;  %v96_v38 = vsub.s32 1, %v91_v35 }
  0x53   :  { %282 = vmatpush1.msra.mxu1 %v179_v39  ;;  %452 = vmatpush3.msra.mxu0 %v338_v17  ;;  %v331_v31 = vld [vmem:[#allocation7 + $0x28] sm:$0xff]  ;;  %v330_v33 = vld [vmem:[#allocation7 + $0x20] sm:$0xff]  ;;  %v88_v37 = vld [vmem:[%s650_s2] sm:$0x3] }
  0x54   :  { %283 = vmatprep.subr.mxu1 %v178_v40  ;;  %453 = vmatprep.subr.mxu0 %v353_v18  ;;  %v93_v39 = vrot.slane %v88_v37, %v92_v36  ;;  %v97_v40 = vrot.slane %v88_v37, %v96_v38 }
  0x55   :  { %284 = vmatpush1.msra.mxu1 %v177_v41  ;;  %454 = vmatpush3.msra.mxu0 %v337_v19 }
  0x56   :  { %285 = vmatprep.subr.mxu1 %v240_v42  ;;  %455 = vmatprep.subr.mxu0 %v352_v20 }
  0x57   :  { %286 = vmatpush2.msra.mxu1 %v239_v43  ;;  %456 = vmatpush3.msra.mxu0 %v336_v21 }
  0x58   :  { %287 = vmatprep.subr.mxu1 %v238_v44  ;;  %457 = vmatprep.subr.mxu0 %v351_v22 }
  0x59   :  { %288 = vmatpush2.msra.mxu1 %v237_v45  ;;  %458 = vmatpush3.msra.mxu0 %v335_v23 }
  0x5a   :  { %289 = vmatprep.subr.mxu1 %v236_v46  ;;  %459 = vmatprep.subr.mxu0 %v350_v24 }
  0x5b   :  { %290 = vmatpush2.msra.mxu1 %v235_v47  ;;  %460 = vmatpush3.msra.mxu0 %v334_v25  ;;  %v345_v47 = vld [vmem:[#allocation7 + $0x98] sm:$0xff] }
  0x5c   :  { %291 = vmatprep.subr.mxu1 %v234_v48  ;;  %461 = vmatprep.subr.mxu0 %v349_v26  ;;  %v329_v48 = vld [vmem:[#allocation7 + $0x18] sm:$0xff] }
  0x5d   :  { %292 = vmatpush2.msra.mxu1 %v233_v49  ;;  %462 = vmatpush3.msra.mxu0 %v333_v27  ;;  %v344_v49 = vld [vmem:[#allocation7 + $0x90] sm:$0xff] }
  0x5e   :  { %293 = vmatprep.subr.mxu1 %v232_v50  ;;  %463 = vmatprep.subr.mxu0 %v348_v28  ;;  %v328_v50 = vld [vmem:[#allocation7 + $0x10] sm:$0xff] }
  0x5f   :  { %294 = vmatpush2.msra.mxu1 %v231_v51  ;;  %464 = vmatpush3.msra.mxu0 %v332_v29  ;;  %v343_v51 = vld [vmem:[#allocation7 + $0x88] sm:$0xff] }
  0x60   :  { %295 = vmatprep.subr.mxu1 %v230_v52  ;;  %465 = vmatprep.subr.mxu0 %v347_v30  ;;  %v327_v52 = vld [vmem:[#allocation7 + $0x8] sm:$0xff] }
  0x61   :  { %296 = vmatpush2.msra.mxu1 %v229_v53  ;;  %466 = vmatpush3.msra.mxu0 %v331_v31  ;;  %v342_v53 = vld [vmem:[#allocation7 + $0x80] sm:$0xff] }
  0x62   :  { %297 = vmatprep.subr.mxu1 %v228_v54  ;;  %467 = vmatprep.subr.mxu0 %v346_v32  ;;  %v326_v54 = vld [vmem:[#allocation7] sm:$0xff] }
  0x63   :  { %298 = vmatpush2.msra.mxu1 %v227_v55  ;;  %468 = vmatpush3.msra.mxu0 %v330_v33  ;;  %v241_v55 = vld [vmem:[%s652_s4] sm:$0x3] }
  0x64   :  { %299 = vmatprep.subr.mxu1 %v226_v56  ;;  %469 = vmatprep.subr.mxu0 %v345_v47  ;;  %v246_v56 = vrot.slane %v241_v55, %v92_v36 }
  0x65   :  { %300 = vmatpush2.msra.mxu1 %v225_v57  ;;  %470 = vmatpush3.msra.mxu0 %v329_v48  ;;  %v250_v57 = vrot.slane %v241_v55, %v96_v38 }
  0x66   :  { %301 = vmatprep.subr.mxu1 %v224_v58  ;;  %471 = vmatprep.subr.mxu0 %v344_v49 }
  0x67   :  { %302 = vmatpush2.msra.mxu1 %v223_v59  ;;  %472 = vmatpush3.msra.mxu0 %v328_v50 }
  0x68   :  { %303 = vmatprep.subr.mxu1 %v222_v60  ;;  %473 = vmatprep.subr.mxu0 %v343_v51 }
  0x69   :  { %304 = vmatpush2.msra.mxu1 %v221_v61  ;;  %474 = vmatpush3.msra.mxu0 %v327_v52 }
  0x6a   :  { %305 = vmatprep.subr.mxu1 %v220_v62  ;;  %475 = vmatprep.subr.mxu0 %v342_v53 }
  0x6b   :  { %306 = vmatpush2.msra.mxu1 %v219_v63  ;;  %476 = vmatpush3.msra.mxu0 %v326_v54 }
  0x6c   :  { %307 = vmatprep.subr.mxu1 %v218_v0 }
  0x6d   :  { %308 = vmatpush2.msra.mxu1 %v217_v1  ;;  %v444_v1 = vld [vmem:[%s654_s6] ss:$0 sm:$0xff] }
  0x6e   :  { %309 = vmatprep.subr.mxu1 %v216_v2 }
  0x6f   :  { %310 = vmatpush2.msra.mxu1 %v215_v3 }
  0x70   :  { %311 = vmatprep.subr.mxu1 %v214_v4 }
  0x71   :  { %312 = vmatpush2.msra.mxu1 %v213_v5 }
  0x72   :  { %313 = vmatprep.subr.mxu1 %v212_v6 }
  0x73   :  { %314 = vmatpush2.msra.mxu1 %v211_v7 }
  0x74   :  { %315 = vmatprep.subr.mxu1 %v210_v8 }
  0x75   :  { %316 = vmatpush2.msra.mxu1 %v209_v9 }
  0xfc   :  { %v170_v41 = vpop.f32.mrf.mxu0 }
  0xfd   :  { %v171_v42 = vadd.f32 %v170_v41, %v93_v39 }
  0xfe   :  { %v172_v43 = vpop.f32.mrf.mxu0 }
  0xff   :  { %v173_v44 = vadd.f32 %v172_v43, %v97_v40  ;;  %v175_v46 = vmax.f32 %v171_v42, 0.0 }
 0x101   :  { %v176_v45 = vmax.f32 %v173_v44, 0.0 }
 0x103   :  { %317 = vmatprep.mubr.f32.mxu1 %v176_v45 }
 0x104   :  { %318 = vmatmul.mubr.f32.vlgmr.msra.gmra.mxu1 %v175_v46 }
 0x1c4   :  { %v319_v58 = vpop.f32.mrf.mxu1 }
 0x1c5   :  { %v320_v59 = vadd.f32 %v319_v58, %v246_v56 }
 0x1c6   :  { %v321_v60 = vpop.f32.mrf.mxu1 }
 0x1c7   :  { %v322_v61 = vadd.f32 %v321_v60, %v250_v57  ;;  %v324_v63 = vmax.f32 %v320_v59, 0.0 }
 0x1c9   :  { %v325_v62 = vmax.f32 %v322_v61, 0.0 }
 0x1cb   :  { %429 = vmatprep.mubr.f32.mxu0 %v325_v62 }
 0x1cc   :  { %430 = vmatmul.mubr.f32.vlgmr.msra.gmra.mxu0 %v324_v63 }
 0x28c   :  { %v477_v0 = vpop.f32.mrf.mxu0 }
 0x28e   :  { %v478_v2 = vpop.f32.mrf.mxu0 }
 0x28f   :  { %v479_v3 = vadd.f32 %v478_v2, %v477_v0 }
 0x291   :  { %v432_v4 = vadd.f32 %v479_v3, %v444_v1 }
 0x293   :  { %435 = vst [vmem:[%s655_s7] sm:$0x3] %v432_v4 }
 0x294   :  { %440 = vsyncpa [#allocation3], 1 }
 0x295   :  { %441 = vsyncpa [#allocation5], 1 }
 0x296   :  { %442 = vsyncpa [#allocation8], 1 }

</bundles_post_ra>
